<compile_context>
chip_gen: v5e
topology: v5e:2x2
jax: 0.10.0
libtpu: 0.0.40
codegen_flags: <defaults>
</compile_context>

<pallas_src>
import functools

import jax
import jax.numpy as jnp
from jax.experimental import pallas as pl
from jax.experimental.pallas import tpu as pltpu

LN_EPS = 1e-5


def _round_up(x, m):
    return ((x + m - 1) // m) * m


def _fused_kernel(a_ref, b_ref, wa_ref, wb_ref, bias_ref, gamma_ref, beta_ref, o_ref):
    # a_ref, b_ref: (TR, D) [bf16 or f32]   wa/wb: (D, D)   bias/gamma/beta: (1, D) f32
    # o_ref: (TR, D) f32
    # concat(a, b) @ W + bias  ==  a @ Wa + b @ Wb + bias   (MXU matmuls, f32 accumulation)
    y = jnp.dot(a_ref[...], wa_ref[...], preferred_element_type=jnp.float32)
    y = y + jnp.dot(b_ref[...], wb_ref[...], preferred_element_type=jnp.float32)
    y = y + bias_ref[...]

    # One-pass LayerNorm statistics over the last dim (f32).
    inv_d = jnp.float32(1.0 / y.shape[-1])
    mean = jnp.sum(y, axis=-1, keepdims=True) * inv_d
    mean_sq = jnp.sum(y * y, axis=-1, keepdims=True) * inv_d
    var = jnp.maximum(mean_sq - mean * mean, 0.0)
    inv = jax.lax.rsqrt(var + LN_EPS)
    o_ref[...] = ((y - mean) * inv * gamma_ref[...] + beta_ref[...]).astype(o_ref.dtype)


@functools.partial(jax.jit, static_argnames=("tile_rows", "use_bf16"))
def cross_modal_encoder(a, b, w, bias, gamma, beta, *, tile_rows=512, use_bf16=True):
    """a, b: (B, S, D).  w: (2D, D), bias/gamma/beta: (D,).  Returns (B, S, D) in a.dtype."""
    B, S, D = a.shape
    rows = B * S

    compute_dtype = jnp.bfloat16 if use_bf16 else jnp.float32
    # bf16 sublane packing prefers 16-row multiples; f32 needs 8.
    row_mult = 16 if use_bf16 else 8

    a2 = a.reshape(rows, D).astype(compute_dtype)
    b2 = b.reshape(rows, D).astype(compute_dtype)
    wa = w[:D, :].astype(compute_dtype)
    wb = w[D:, :].astype(compute_dtype)
    bias2 = bias.reshape(1, D).astype(jnp.float32)
    gamma2 = gamma.reshape(1, D).astype(jnp.float32)
    beta2 = beta.reshape(1, D).astype(jnp.float32)

    # Clamp tile size for tiny inputs, keep it a legal multiple otherwise.
    tr = max(row_mult, min(_round_up(tile_rows, row_mult), _round_up(rows, row_mult)))
    padded_rows = _round_up(rows, tr)
    if padded_rows != rows:
        pad = padded_rows - rows
        a2 = jnp.pad(a2, ((0, pad), (0, 0)))
        b2 = jnp.pad(b2, ((0, pad), (0, 0)))

    grid = (padded_rows // tr,)
    row_spec_in = pl.BlockSpec((tr, D), lambda i: (i, 0))
    full_w_spec = pl.BlockSpec((D, D), lambda i: (0, 0))
    vec_spec = pl.BlockSpec((1, D), lambda i: (0, 0))
    row_spec_out = pl.BlockSpec((tr, D), lambda i: (i, 0))

    itemsize_in = jnp.dtype(compute_dtype).itemsize
    cost = pl.CostEstimate(
        flops=4 * rows * D * D,                      # two (rows,D)x(D,D) matmuls
        transcendentals=rows,                        # one rsqrt per row
        bytes_accessed=(2 * rows * D * itemsize_in   # a, b reads
                        + 2 * D * D * itemsize_in    # weight halves
                        + 3 * D * 4                  # bias/gamma/beta
                        + rows * D * 4),             # f32 output writeback
    )

    out = pl.pallas_call(
        _fused_kernel,
        out_shape=jax.ShapeDtypeStruct((padded_rows, D), jnp.float32),
        grid_spec=pltpu.PrefetchScalarGridSpec(
            num_scalar_prefetch=0,
            grid=grid,
            in_specs=[row_spec_in, row_spec_in, full_w_spec, full_w_spec,
                      vec_spec, vec_spec, vec_spec],
            out_specs=row_spec_out,
        ),
        compiler_params=pltpu.CompilerParams(dimension_semantics=("parallel",)),
        cost_estimate=cost,
    )(a2, b2, wa, wb, bias2, gamma2, beta2)

    return out[:rows].reshape(B, S, D).astype(a.dtype)


def _reference(a, b, w, bias, gamma, beta):
    x = jnp.concatenate([a, b], axis=-1)
    y = x @ w + bias
    mean = y.mean(-1, keepdims=True)
    var = ((y - mean) ** 2).mean(-1, keepdims=True)
    return (y - mean) / jnp.sqrt(var + LN_EPS) * gamma + beta


if __name__ == "__main__":
    D = 32
    key = jax.random.PRNGKey(0)
    k_a, k_b, k_w, k_bias, k_g, k_be = jax.random.split(key, 6)

    # Deterministic parameter init (Linear(2D, D) + LayerNorm(D))
    w = jax.random.normal(k_w, (2 * D, D), dtype=jnp.float32) * (1.0 / jnp.sqrt(2.0 * D))
    bias = jax.random.normal(k_bias, (D,), dtype=jnp.float32) * 0.01
    gamma = jnp.ones((D,), dtype=jnp.float32) + 0.1 * jax.random.normal(k_g, (D,), dtype=jnp.float32)
    beta = 0.1 * jax.random.normal(k_be, (D,), dtype=jnp.float32)

    # Case 1: small shape, f32 path (tight correctness check of the fused kernel math).
    B, S = 2, 8
    a = jax.random.normal(k_a, (B, S, D), dtype=jnp.float32)
    b = jax.random.normal(k_b, (B, S, D), dtype=jnp.float32)
    out_f32 = jax.block_until_ready(cross_modal_encoder(a, b, w, bias, gamma, beta, use_bf16=False))
    ref = _reference(a, b, w, bias, gamma, beta)
    assert jnp.allclose(out_f32, ref, atol=1e-4, rtol=1e-4), "f32 kernel mismatch vs reference"

    # Case 2: default (bf16 matmul operands, f32 LN) + a non-divisible row count to
    # exercise the cdiv/padding tail path.
    out_bf16 = jax.block_until_ready(cross_modal_encoder(a, b, w, bias, gamma, beta))
    assert jnp.allclose(out_bf16, ref, atol=3e-2, rtol=3e-2), "bf16 kernel mismatch vs reference"

    B2, S2 = 3, 37  # rows = 111, not a multiple of the tile -> padded tail tile
    a2 = jax.random.normal(jax.random.PRNGKey(1), (B2, S2, D), dtype=jnp.float32)
    b2 = jax.random.normal(jax.random.PRNGKey(2), (B2, S2, D), dtype=jnp.float32)
    out2 = jax.block_until_ready(
        cross_modal_encoder(a2, b2, w, bias, gamma, beta, tile_rows=512))
    ref2 = _reference(a2, b2, w, bias, gamma, beta)
    assert jnp.allclose(out2, ref2, atol=3e-2, rtol=3e-2), "padded-tail kernel mismatch vs reference"

    # TODO(synk): pos_enc / encoder sub-modules are config-driven and None in this config;
    # not implemented here.
    print("KERNEL_OK")
</pallas_src>

<mosaic_0001>
module attributes {stable_mosaic.version = 11 : i64} {
  func.func @_fused_kernel(%arg0: i32, %arg1: memref<16x32xf32, #tpu.memory_space<vmem>>, %arg2: memref<16x32xf32, #tpu.memory_space<vmem>>, %arg3: memref<32x32xf32, #tpu.memory_space<vmem>>, %arg4: memref<32x32xf32, #tpu.memory_space<vmem>>, %arg5: memref<1x32xf32, #tpu.memory_space<vmem>>, %arg6: memref<1x32xf32, #tpu.memory_space<vmem>>, %arg7: memref<1x32xf32, #tpu.memory_space<vmem>>, %arg8: memref<16x32xf32, #tpu.memory_space<vmem>>) attributes {dimension_semantics = [#tpu.dimension_semantics<parallel>], iteration_bounds = array<i64: 1>, scalar_prefetch = 0 : i64, scratch_operands = 0 : i64, tpu.core_type = #tpu.core_type<tc>, window_params = [{transform_indices = @transform_0, window_bounds = array<i64: 16, 32>}, {transform_indices = @transform_1, window_bounds = array<i64: 16, 32>}, {pipeline_mode = #tpu.pipeline_mode<synchronous>, transform_indices = @transform_2, window_bounds = array<i64: 32, 32>}, {pipeline_mode = #tpu.pipeline_mode<synchronous>, transform_indices = @transform_3, window_bounds = array<i64: 32, 32>}, {pipeline_mode = #tpu.pipeline_mode<synchronous>, transform_indices = @transform_4, window_bounds = array<i64: 1, 32>}, {pipeline_mode = #tpu.pipeline_mode<synchronous>, transform_indices = @transform_5, window_bounds = array<i64: 1, 32>}, {pipeline_mode = #tpu.pipeline_mode<synchronous>, transform_indices = @transform_6, window_bounds = array<i64: 1, 32>}, {transform_indices = @transform_7, window_bounds = array<i64: 16, 32>}]} {
    %c0 = arith.constant 0 : index
    %c0_0 = arith.constant 0 : index
    %0 = vector.load %arg1[%c0, %c0_0] : memref<16x32xf32, #tpu.memory_space<vmem>>, vector<16x32xf32>
    %c0_1 = arith.constant 0 : index
    %c0_2 = arith.constant 0 : index
    %1 = vector.load %arg3[%c0_1, %c0_2] : memref<32x32xf32, #tpu.memory_space<vmem>>, vector<32x32xf32>
    %cst = arith.constant dense<0.000000e+00> : vector<16x32xf32>
    %2 = tpu.matmul %0, %1, %cst {dimension_numbers = #tpu.dot_dimension_numbers<[1], [0], [0], [1], [0, 0, 1, 1], [], []>} : vector<16x32xf32>, vector<32x32xf32>, vector<16x32xf32> -> vector<16x32xf32>
    %c0_3 = arith.constant 0 : index
    %c0_4 = arith.constant 0 : index
    %3 = vector.load %arg2[%c0_3, %c0_4] : memref<16x32xf32, #tpu.memory_space<vmem>>, vector<16x32xf32>
    %c0_5 = arith.constant 0 : index
    %c0_6 = arith.constant 0 : index
    %4 = vector.load %arg4[%c0_5, %c0_6] : memref<32x32xf32, #tpu.memory_space<vmem>>, vector<32x32xf32>
    %cst_7 = arith.constant dense<0.000000e+00> : vector<16x32xf32>
    %5 = tpu.matmul %3, %4, %cst_7 {dimension_numbers = #tpu.dot_dimension_numbers<[1], [0], [0], [1], [0, 0, 1, 1], [], []>} : vector<16x32xf32>, vector<32x32xf32>, vector<16x32xf32> -> vector<16x32xf32>
    %6 = arith.addf %2, %5 : vector<16x32xf32>
    %c0_8 = arith.constant 0 : index
    %c0_9 = arith.constant 0 : index
    %7 = vector.load %arg5[%c0_8, %c0_9] : memref<1x32xf32, #tpu.memory_space<vmem>>, vector<1x32xf32>
    %8 = vector.broadcast %7 : vector<1x32xf32> to vector<16x32xf32>
    %9 = arith.addf %6, %8 : vector<16x32xf32>
    %cst_10 = arith.constant dense<0.000000e+00> : vector<16xf32>
    %10 = vector.multi_reduction <add>, %9, %cst_10 [1] : vector<16x32xf32> to vector<16xf32>
    %11 = vector.shape_cast %10 : vector<16xf32> to vector<16x1xf32>
    %cst_11 = arith.constant 3.125000e-02 : f32
    %12 = vector.broadcast %cst_11 : f32 to vector<16x1xf32>
    %13 = arith.mulf %11, %12 : vector<16x1xf32>
    %14 = arith.mulf %9, %9 : vector<16x32xf32>
    %cst_12 = arith.constant dense<0.000000e+00> : vector<16xf32>
    %15 = vector.multi_reduction <add>, %14, %cst_12 [1] : vector<16x32xf32> to vector<16xf32>
    %16 = vector.shape_cast %15 : vector<16xf32> to vector<16x1xf32>
    %cst_13 = arith.constant 3.125000e-02 : f32
    %17 = vector.broadcast %cst_13 : f32 to vector<16x1xf32>
    %18 = arith.mulf %16, %17 : vector<16x1xf32>
    %19 = arith.mulf %13, %13 : vector<16x1xf32>
    %20 = arith.subf %18, %19 : vector<16x1xf32>
    %cst_14 = arith.constant 0.000000e+00 : f32
    %21 = vector.broadcast %cst_14 : f32 to vector<16x1xf32>
    %22 = arith.maximumf %20, %21 : vector<16x1xf32>
    %cst_15 = arith.constant 9.99999974E-6 : f32
    %23 = vector.broadcast %cst_15 : f32 to vector<16x1xf32>
    %24 = arith.addf %22, %23 : vector<16x1xf32>
    %25 = math.rsqrt %24 : vector<16x1xf32>
    %26 = vector.broadcast %13 : vector<16x1xf32> to vector<16x32xf32>
    %27 = arith.subf %9, %26 : vector<16x32xf32>
    %28 = vector.broadcast %25 : vector<16x1xf32> to vector<16x32xf32>
    %29 = arith.mulf %27, %28 : vector<16x32xf32>
    %c0_16 = arith.constant 0 : index
    %c0_17 = arith.constant 0 : index
    %30 = vector.load %arg6[%c0_16, %c0_17] : memref<1x32xf32, #tpu.memory_space<vmem>>, vector<1x32xf32>
    %31 = vector.broadcast %30 : vector<1x32xf32> to vector<16x32xf32>
    %32 = arith.mulf %29, %31 : vector<16x32xf32>
    %c0_18 = arith.constant 0 : index
    %c0_19 = arith.constant 0 : index
    %33 = vector.load %arg7[%c0_18, %c0_19] : memref<1x32xf32, #tpu.memory_space<vmem>>, vector<1x32xf32>
    %34 = vector.broadcast %33 : vector<1x32xf32> to vector<16x32xf32>
    %35 = arith.addf %32, %34 : vector<16x32xf32>
    %c0_20 = arith.constant 0 : index
    %c0_21 = arith.constant 0 : index
    %36 = vector.load %arg8[%c0_20, %c0_21] : memref<16x32xf32, #tpu.memory_space<vmem>>, vector<16x32xf32>
    tpu.vector_store %arg8[%c0_20, %c0_21], %35 {strides = array<i32>} : memref<16x32xf32, #tpu.memory_space<vmem>>, vector<16x32xf32>,
    return
  }
  func.func @transform_0(%arg0: i32) -> (i32, i32) {
    %c0_i32 = arith.constant 0 : i32
    %c0_i32_0 = arith.constant 0 : i32
    return %arg0, %c0_i32 : i32, i32
  }
  func.func @transform_1(%arg0: i32) -> (i32, i32) {
    %c0_i32 = arith.constant 0 : i32
    %c0_i32_0 = arith.constant 0 : i32
    return %arg0, %c0_i32 : i32, i32
  }
  func.func @transform_2(%arg0: i32) -> (i32, i32) {
    %c0_i32 = arith.constant 0 : i32
    %c0_i32_0 = arith.constant 0 : i32
    %c0_i32_1 = arith.constant 0 : i32
    return %c0_i32, %c0_i32_0 : i32, i32
  }
  func.func @transform_3(%arg0: i32) -> (i32, i32) {
    %c0_i32 = arith.constant 0 : i32
    %c0_i32_0 = arith.constant 0 : i32
    %c0_i32_1 = arith.constant 0 : i32
    return %c0_i32, %c0_i32_0 : i32, i32
  }
  func.func @transform_4(%arg0: i32) -> (i32, i32) {
    %c0_i32 = arith.constant 0 : i32
    %c0_i32_0 = arith.constant 0 : i32
    %c0_i32_1 = arith.constant 0 : i32
    return %c0_i32, %c0_i32_0 : i32, i32
  }
  func.func @transform_5(%arg0: i32) -> (i32, i32) {
    %c0_i32 = arith.constant 0 : i32
    %c0_i32_0 = arith.constant 0 : i32
    %c0_i32_1 = arith.constant 0 : i32
    return %c0_i32, %c0_i32_0 : i32, i32
  }
  func.func @transform_6(%arg0: i32) -> (i32, i32) {
    %c0_i32 = arith.constant 0 : i32
    %c0_i32_0 = arith.constant 0 : i32
    %c0_i32_1 = arith.constant 0 : i32
    return %c0_i32, %c0_i32_0 : i32, i32
  }
  func.func @transform_7(%arg0: i32) -> (i32, i32) {
    %c0_i32 = arith.constant 0 : i32
    %c0_i32_0 = arith.constant 0 : i32
    return %arg0, %c0_i32 : i32, i32
  }
}

</mosaic_0001>

<bundles_post_ra>
// kernel: cross_modal_encoder.1
= control target key start
LH: loop header
LB: loop body
LE: loop exit
PB: predicated region body
PF: predicated region fallthrough
CT: control target
= control target key end

     0   :  { %s335_s0 = inlined_call_operand.vmem [shape: f32[16,32], index: 0, kind: input, shape index: {}]   ;;  %s336_s1 = inlined_call_operand.vmem [shape: f32[16,32], index: 1, kind: input, shape index: {}]   ;;  %s337_s2 = inlined_call_operand.vmem [shape: f32[32,32], index: 2, kind: input, shape index: {}]   ;;  %s338_s3 = inlined_call_operand.vmem [shape: f32[32,32], index: 3, kind: input, shape index: {}]   ;;  %s339_s4 = inlined_call_operand.vmem [shape: f32[1,32], index: 4, kind: input, shape index: {}]   ;;  %s340_s5 = inlined_call_operand.vmem [shape: f32[1,32], index: 5, kind: input, shape index: {}]   ;;  %s341_s6 = inlined_call_operand.vmem [shape: f32[1,32], index: 6, kind: input, shape index: {}]   ;;  %s342_s7 = inlined_call_operand.hbm [shape: f32[16,32], index: 7, kind: output, shape index: {}]  }
   0x1   :  { %v38_v0 = vld [vmem:[%s338_s3 + $0x18] sm:$0xff]  ;;  %v37_v2 = vld [vmem:[%s338_s3 + $0x10] sm:$0xff]  ;;  %v36_v4 = vld [vmem:[%s338_s3 + $0x8] sm:$0xff] }
   0x2   :  { %v32_v1 = vld [vmem:[%s337_s2 + $0x18] sm:$0xff]  ;;  %58 = vmatpush.msra.mxu0 %v38_v0  ;;  %v31_v3 = vld [vmem:[%s337_s2 + $0x10] sm:$0xff]  ;;  %190 = vmatpush.msra.mxu2 %v38_v0  ;;  %v30_v5 = vld [vmem:[%s337_s2 + $0x8] sm:$0xff] }
   0x3   :  { %87 = vmatpush.msra.mxu1 %v32_v1  ;;  %194 = vmatpush.msra.mxu3 %v32_v1  ;;  %v35_v6 = vld [vmem:[%s338_s3] sm:$0xff] }
   0x4   :  { %59 = vmatpush.msra.mxu0 %v37_v2  ;;  %v29_v7 = vld [vmem:[%s337_s2] sm:$0xff]  ;;  %191 = vmatpush.msra.mxu2 %v37_v2 }
   0x5   :  { %88 = vmatpush.msra.mxu1 %v31_v3  ;;  %195 = vmatpush.msra.mxu3 %v31_v3 }
   0x6   :  { %12 = vsyncpa [#allocation3], 0  ;;  %60 = vmatpush.msra.mxu0 %v36_v4  ;;  %v33_v8 = vld [vmem:[%s336_s1] sm:$0xff]  ;;  %vm39_vm0 = vcmask 261120   ;;  %192 = vmatpush.msra.mxu2 %v36_v4  ;;  %v34_v10 = vld [vmem:[%s336_s1 + $0x8] sm:$0xff]  ;;  %s174_s29 = sshll.u32 %s342_s7, 4  ;;  %s175_s29 = int_to_ptr.hbm [resolvable:$true] %s174_s29 }
   0x7   :  { %89 = vmatpush.msra.mxu1 %v30_v5  ;;  %v27_v9 = vld [vmem:[%s335_s0] sm:$0xff]  ;;  %196 = vmatpush.msra.mxu3 %v30_v5  ;;  %v28_v11 = vld [vmem:[%s335_s0 + $0x8] sm:$0xff]  ;;  %s236_s30 = smov 8  }
   0x8   :  { %61 = vmatpush.msra.mxu0 %v35_v6  ;;  %193 = vmatpush.msra.mxu2 %v35_v6  ;;  %v201_v12 = vld [vmem:[%s339_s4] ss:$0 sm:$0xff] }
   0x9   :  { %90 = vmatpush.msra.mxu1 %v29_v7  ;;  %186 = vmatmul.msk.f32.vlgmr.msra.gmra.mxu0 %vm39_vm0, %v33_v8  ;;  %v202_v51 = vld [vmem:[%s340_s5] ss:$0 sm:$0xff]  ;;  %s234_s5 = smov [#allocation2]  }
   0xa   :  { %188 = vmatmul.msk.f32.vlgmr.msra.gmra.mxu1 %vm39_vm0, %v27_v9  ;;  %197 = vmatpush.msra.mxu3 %v29_v7  ;;  %v203_v56 = vld [vmem:[%s341_s6] ss:$0 sm:$0xff]  ;;  %s172_s26 = sshll.u32 %s234_s5, 4  ;;  %s235_s6 = smov 128   ;;  %s173_s26 = int_to_ptr.vmem [resolvable:$true] %s172_s26 }
   0xb   :  { %187 = vmatmul.msk.f32.vlgmr.msra.gmra.mxu2 %vm39_vm0, %v34_v10  ;;  %189 = vmatmul.msk.f32.vlgmr.msra.gmra.mxu3 %vm39_vm0, %v28_v11 }
  0x86   :  { %v63_v13 = vpop.f32.mrf.mxu0 }
  0x87   :  { %v92_v14 = vpop.f32.mrf.mxu1 }
  0x88   :  { %v93_v15 = vadd.f32 %v92_v14, %v63_v13 }
  0x8a   :  { %v102_v16 = vadd.f32 %v201_v12, %v93_v15 }
  0x8c   :  { %v104_v17 = vsel %vm39_vm0, %v102_v16, 0.0  ;;  %v112_v18 = vmul.f32 %v102_v16, %v102_v16 }
  0x8d   :  { %105 = vadd.xlane.f32.xlu0 %v104_v17 }
  0x8e   :  { %v114_v19 = vsel %vm39_vm0, %v112_v18, 0.0  ;;  %v66_v20 = vpop.f32.mrf.mxu2  ;;  %v95_v21 = vpop.f32.mrf.mxu3 }
  0x8f   :  { %115 = vadd.xlane.f32.xlu1 %v114_v19  ;;  %v96_v22 = vadd.f32 %v95_v21, %v66_v20 }
  0x91   :  { %v103_v23 = vadd.f32 %v201_v12, %v96_v22 }
  0x93   :  { %v107_v24 = vsel %vm39_vm0, %v103_v23, 0.0  ;;  %v113_v25 = vmul.f32 %v103_v23, %v103_v23 }
  0x95   :  { %108 = vadd.xlane.f32.xlu0 %v107_v24  ;;  %v117_v26 = vsel %vm39_vm0, %v113_v25, 0.0 }
  0x97   :  { %118 = vadd.xlane.f32.xlu1 %v117_v26 }
 0x100   :  { %v106_v27 = vpop.xlane.xlu0 %105 }
 0x101   :  { %v110_v28 = vmul.f32 0.03125, %v106_v27 }
 0x102   :  { %v116_v29 = vpop.xlane.xlu1 %115 }
 0x103   :  { %v122_v30 = vmul.f32 %v110_v28, %v110_v28  ;;  %v120_v31 = vmul.f32 0.03125, %v116_v29  ;;  %v150_v50 = vsub.f32 %v102_v16, %v110_v28 }
 0x105   :  { %v124_v32 = vsub.f32 %v120_v31, %v122_v30 }
 0x107   :  { %v126_v33 = vmax.f32 %v124_v32, 0.0 }
 0x108   :  { %v109_v34 = vpop.xlane.xlu0 %108 }
 0x109   :  { %v128_v35 = vadd.f32 1e-05, %v126_v33  ;;  %v111_v36 = vmul.f32 0.03125, %v109_v34 }
 0x10a   :  { %v119_v37 = vpop.xlane.xlu1 %118 }
 0x10b   :  { %204 = vrsqrt.f32 %v128_v35  ;;  %v123_v38 = vmul.f32 %v111_v36, %v111_v36  ;;  %v121_v39 = vmul.f32 0.03125, %v119_v37  ;;  %vm136_vm2 = vweird.f32 %v128_v35 }
 0x10c   :  { %v151_v62 = vsub.f32 %v103_v23, %v111_v36 }
 0x10d   :  { %v125_v40 = vsub.f32 %v121_v39, %v123_v38 }
 0x10f   :  { %v127_v41 = vmax.f32 %v125_v40, 0.0 }
 0x111   :  { %v205_v42 = vpop.eup %204  ;;  %v129_v44 = vadd.f32 1e-05, %v127_v41 }
 0x112   :  { %v131_v43 = vmul.f32 %v205_v42, %v128_v35  ;;  %vm137_vm1 = vweird.f32 %v205_v42 }
 0x113   :  { %206 = vrsqrt.f32 %v129_v44  ;;  %vm138_vm3 = vmor %vm136_vm2, %vm137_vm1  ;;  %vm146_vm5 = vweird.f32 %v129_v44 }
 0x114   :  { %v132_v45 = vmul.f32 %v205_v42, %v131_v43 }
 0x116   :  { %v133_v46 = vmul.f32 0.5, %v132_v45 }
 0x118   :  { %v134_v47 = vsub.f32 1.5, %v133_v46 }
 0x119   :  { %v207_v48 = vpop.eup %206 }
 0x11a   :  { %v135_v49 = vmul.f32 %v205_v42, %v134_v47  ;;  %v141_v52 = vmul.f32 %v207_v48, %v129_v44  ;;  %vm147_vm4 = vweird.f32 %v207_v48 }
 0x11b   :  { %vm148_vm6 = vmor %vm146_vm5, %vm147_vm4 }
 0x11c   :  { %v139_v53 = vsel %vm138_vm3, %v205_v42, %v135_v49  ;;  %v142_v55 = vmul.f32 %v207_v48, %v141_v52 }
 0x11d   :  { %v152_v54 = vmul.f32 %v150_v50, %v139_v53 }
 0x11e   :  { %v143_v58 = vmul.f32 0.5, %v142_v55 }
 0x11f   :  { %v158_v57 = vmul.f32 %v202_v51, %v152_v54 }
 0x120   :  { %v144_v59 = vsub.f32 1.5, %v143_v58 }
 0x121   :  { %v164_v60 = vadd.f32 %v203_v56, %v158_v57 }
 0x122   :  { %v145_v61 = vmul.f32 %v207_v48, %v144_v59 }
 0x123   :  { %166 = vst.msk [vmem:[#allocation2] sm:$0xff] %vm39_vm0, %v164_v60 }
 0x124   :  { %v149_v63 = vsel %vm148_vm6, %v207_v48, %v145_v61 }
 0x125   :  { %v153_v0 = vmul.f32 %v151_v62, %v149_v63 }
 0x127   :  { %v159_v1 = vmul.f32 %v202_v51, %v153_v0 }
 0x129   :  { %v165_v2 = vadd.f32 %v203_v56, %v159_v1 }
 0x12b   :  { %167 = vst.msk [vmem:[#allocation2 + $0x8] sm:$0xff] %vm39_vm0, %v165_v2 }
 0x12c   :  { %180 = dma.vmem_to_hbm [thread:$0]  %s173_s26, 256, %s175_s29, [#allocation3], %s235_s6, %s235_s6, %s236_s30  }
 0x12d   :  { %232 = dma.done.wait [#allocation3], 256  }
 0x12e   :  { %233 = vsyncadd [#allocation3], 4294967040 }
 0x12f   :  { %185 = vsyncpa [#allocation3], 1 }

</bundles_post_ra>
